<compile_context>
chip_gen: v6e
topology: v6e:2x2x1
jax: 0.10.0
libtpu: 0.0.40
codegen_flags: <defaults>
</compile_context>

<pallas_src>
import functools

import jax
import jax.numpy as jnp
from jax.experimental import pallas as pl
from jax.experimental.pallas import tpu as pltpu


def _round_up(v, m):
    return ((v + m - 1) // m) * m


# Single-buffer invariant (weight/bias) blocks when this Pallas build exposes
# BlockSpec(pipeline_mode=...); otherwise fall back to default double-buffering.
try:
    pl.BlockSpec((8, 128), lambda i: (0, 0), pipeline_mode=pl.Buffered(1))
    _HAS_PIPELINE_MODE = True
except Exception:  # pragma: no cover - older Pallas without pipeline_mode
    _HAS_PIPELINE_MODE = False


def _vmem_capacity_bytes():
    """Physical VMEM for this TPU generation (128 MiB v5e/v6e, 64 MiB/TC v7x)."""
    try:
        return int(pltpu.get_tpu_info().vmem_capacity_bytes)
    except Exception:
        return 64 * 1024 * 1024  # conservative fallback: v7x per-TensorCore VMEM


def autoencoder_kernel(x_ref,
                       w1_ref, b1_ref,
                       w2_ref, b2_ref,
                       w3_ref, b3_ref,
                       w4_ref, b4_ref,
                       o_ref):
    # MXU operand dtype follows the weights (f32 or bf16); accumulation is f32.
    mm = w1_ref.dtype
    x = x_ref[...].astype(mm)  # cast in-kernel: no extra HBM pass over x

    # Encoder
    h = jnp.dot(x, w1_ref[...], preferred_element_type=jnp.float32) + b1_ref[...]
    h = jnp.maximum(h, 0.0)                                     # ReLU (f32 VPU)
    z = jnp.dot(h.astype(mm), w2_ref[...],
                preferred_element_type=jnp.float32) + b2_ref[...]
    z = jnp.maximum(z, 0.0)                                     # ReLU

    # Decoder
    d = jnp.dot(z.astype(mm), w3_ref[...],
                preferred_element_type=jnp.float32) + b3_ref[...]
    d = jnp.maximum(d, 0.0)                                     # ReLU
    logits = jnp.dot(d.astype(mm), w4_ref[...],
                     preferred_element_type=jnp.float32) + b4_ref[...]
    # TODO(synk): if a bundle dump shows masked vst's dominating (input_dim << 128),
    # present a lane-dense (.., 128) output view instead; the DMA is already contiguous.
    o_ref[...] = jax.nn.sigmoid(logits).astype(o_ref.dtype)     # Sigmoid (f32 EUP)


def _choose_tile_b(batch, row_bytes, align, target_bytes):
    """Rows per grid step: aim for multi-MiB x tiles that divide the batch exactly."""
    target = (int(target_bytes) // max(1, row_bytes)) // align * align
    target = max(align, min(target, 8192))
    if batch <= target:
        # Whole batch fits in one tile.  Split in two for megacore (v7x) when it
        # is big enough to matter and splits without introducing padding.
        if batch * row_bytes > (1 << 20) and batch % (2 * align) == 0:
            return batch // 2
        return _round_up(batch, align)
    # >= 2 grid steps from here on.  Prefer the largest divisor of `batch` that
    # is a multiple of `align` and <= target, so no pad / slice pass is needed.
    best = 0
    if batch % align == 0:
        q = batch // align
        for d in range(target // align, 0, -1):
            if q % d == 0:
                best = d * align
                break
    if best * 4 >= target:       # accept unless it forces tiles < 25% of target
        return best
    return target                # ragged batch: wrapper pads (rare case)


@functools.partial(jax.jit,
                   static_argnames=("tile_b", "matmul_dtype", "tile_target_bytes"))
def autoencoder_forward(x, params, *, tile_b=None, matmul_dtype=None,
                        tile_target_bytes=2 * 1024 * 1024):
    """x: (B, input_dim).  params: w{i} of shape (in,out), b{i} of shape (1,out).

    tile_b: optional override for rows per grid step (auto-sized otherwise).
    matmul_dtype: optional MXU operand dtype (jnp.bfloat16 recommended on
                  v5e/v6e/v7x when the looser tolerance is acceptable).
    """
    w1, b1, w2, b2, w3, b3, w4, b4 = (params[k] for k in
                                      ("w1", "b1", "w2", "b2", "w3", "b3", "w4", "b4"))
    B, input_dim = x.shape
    hidden_dim = w1.shape[1]
    bottleneck_dim = w2.shape[1]
    out_dtype = x.dtype

    # --- operand dtypes: weights cast once in the wrapper (halves resident VMEM);
    #     x stays in its HBM dtype and is cast in-kernel (no extra HBM pass). ----
    if matmul_dtype is not None:
        w1c, w2c, w3c, w4c = (w.astype(matmul_dtype) for w in (w1, w2, w3, w4))
    else:
        w1c, w2c, w3c, w4c = w1, w2, w3, w4
    b1c, b2c, b3c, b4c = (b.astype(jnp.float32) for b in (b1, b2, b3, b4))

    mm_itemsize = jnp.dtype(w1c.dtype).itemsize
    x_item = jnp.dtype(x.dtype).itemsize
    out_item = jnp.dtype(out_dtype).itemsize
    weight_bytes = sum(int(w.size) * mm_itemsize for w in (w1c, w2c, w3c, w4c))
    bias_bytes = sum(int(b.size) * 4 for b in (b1c, b2c, b3c, b4c))

    # --- batch tile selection --------------------------------------------------
    align = 16 if mm_itemsize == 2 else 8          # bf16 packs 16 rows / sublane group
    row_bytes = input_dim * x_item
    if tile_b is None:
        tile_b = _choose_tile_b(B, row_bytes, align, tile_target_bytes)
    else:
        tile_b = max(align, _round_up(min(int(tile_b), _round_up(B, align)), align))

    # --- generation-aware VMEM budget; shrink tile if needed --------------------
    def _vmem_bytes(tb):
        buf_w = 1 if _HAS_PIPELINE_MODE else 2
        return (2 * tb * input_dim * x_item                       # x tile (double-buffered)
                + 2 * tb * input_dim * out_item                   # out tile (double-buffered)
                + buf_w * (weight_bytes + bias_bytes)             # resident params
                + tb * (2 * hidden_dim + bottleneck_dim + input_dim) * 4  # f32 intermediates
                + (2 << 20))                                      # compiler scratch slack

    vmem_cap = _vmem_capacity_bytes()
    vmem_budget = max(32 << 20, vmem_cap - (16 << 20))            # keep headroom
    while tile_b > align and _vmem_bytes(tile_b) > vmem_budget:
        tile_b = max(align, _round_up(tile_b // 2, align))

    est = _vmem_bytes(tile_b)
    vmem_limit = int(min(max(est, 32 << 20), vmem_budget))
    vmem_limit = min(max(vmem_limit, est), vmem_cap)              # never below the true need

    # --- grid; pad only when no aligned divisor of B fits (rare) ----------------
    b_pad = _round_up(B, tile_b)
    x_in = x
    if b_pad != B:
        # Costs one extra pass over x (and the slice below one over out); only
        # taken for ragged batches with no suitable aligned divisor.
        x_in = jnp.pad(x, ((0, b_pad - B), (0, 0)))
    grid = (b_pad // tile_b,)

    x_spec = pl.BlockSpec((tile_b, input_dim), lambda i: (i, 0))
    out_spec = pl.BlockSpec((tile_b, input_dim), lambda i: (i, 0))

    def _resident(a):
        # Constant index_map -> fetched once, stays resident; single-buffered.
        kwargs = {"pipeline_mode": pl.Buffered(1)} if _HAS_PIPELINE_MODE else {}
        return pl.BlockSpec(a.shape, lambda i: tuple(0 for _ in a.shape), **kwargs)

    # --- cost estimate (scheduling hint for XLA) --------------------------------
    mm_flops = 2 * b_pad * (input_dim * hidden_dim + hidden_dim * bottleneck_dim
                            + bottleneck_dim * hidden_dim + hidden_dim * input_dim)
    io_bytes = (b_pad * input_dim * x_item + b_pad * input_dim * out_item
                + weight_bytes + bias_bytes)
    cost = pl.CostEstimate(flops=int(mm_flops),
                           transcendentals=int(b_pad * input_dim),
                           bytes_accessed=int(io_bytes))

    out = pl.pallas_call(
        autoencoder_kernel,
        out_shape=jax.ShapeDtypeStruct((b_pad, input_dim), out_dtype),
        grid=grid,
        in_specs=[x_spec,
                  _resident(w1c), _resident(b1c),
                  _resident(w2c), _resident(b2c),
                  _resident(w3c), _resident(b3c),
                  _resident(w4c), _resident(b4c)],
        out_specs=out_spec,
        compiler_params=pltpu.CompilerParams(
            dimension_semantics=("parallel",),   # batch axis shards across TCs on v7x
            vmem_limit_bytes=int(vmem_limit)),
        cost_estimate=cost,
    )(x_in, w1c, b1c, w2c, b2c, w3c, b3c, w4c, b4c)

    return out if b_pad == B else out[:B]


def init_params(key, input_dim, hidden_dim, bottleneck_dim):
    """Deterministic synthetic init (uniform, roughly like PyTorch's default)."""
    dims = [(input_dim, hidden_dim),       # encoder.0
            (hidden_dim, bottleneck_dim),  # encoder.2
            (bottleneck_dim, hidden_dim),  # decoder.0
            (hidden_dim, input_dim)]       # decoder.2
    params = {}
    for i, (fan_in, fan_out) in enumerate(dims, start=1):
        key, kw, kb = jax.random.split(key, 3)
        bound = 1.0 / jnp.sqrt(fan_in)
        params[f"w{i}"] = jax.random.uniform(kw, (fan_in, fan_out), jnp.float32,
                                             minval=-bound, maxval=bound)
        params[f"b{i}"] = jax.random.uniform(kb, (1, fan_out), jnp.float32,
                                             minval=-bound, maxval=bound)
    return params


def reference_forward(x, p):
    h = jnp.maximum(x @ p["w1"] + p["b1"], 0.0)
    z = jnp.maximum(h @ p["w2"] + p["b2"], 0.0)
    d = jnp.maximum(z @ p["w3"] + p["b3"], 0.0)
    return jax.nn.sigmoid(d @ p["w4"] + p["b4"])


if __name__ == "__main__":
    key = jax.random.PRNGKey(0)
    input_dim, hidden_dim, bottleneck_dim = 32, 32, 16
    params = init_params(key, input_dim, hidden_dim, bottleneck_dim)

    key, kx = jax.random.split(key)
    batch = 40
    x = jax.random.normal(kx, (batch, input_dim), jnp.float32)
    ref = reference_forward(x, params)

    # 1) Auto tile, f32 MXU operands (exact): B=40 -> single 40-row tile, no pad.
    out = jax.block_until_ready(autoencoder_forward(x, params))
    assert out.shape == (batch, input_dim)
    assert jnp.allclose(out, ref, atol=1e-5, rtol=1e-5)

    # 2) Forced small tile with ragged batch (pad fallback): tile_b=16 -> grid=(3,).
    out2 = jax.block_until_ready(autoencoder_forward(x, params, tile_b=16))
    assert jnp.allclose(out2, ref, atol=1e-5, rtol=1e-5)

    # 3) Divisor-search path: batch=256 with a tiny tile target -> tile=32, grid=(8,),
    #    no padding and no output slice.
    key, kx2 = jax.random.split(key)
    x256 = jax.random.normal(kx2, (256, input_dim), jnp.float32)
    out3 = jax.block_until_ready(
        autoencoder_forward(x256, params, tile_target_bytes=4096))
    assert out3.shape == (256, input_dim)
    assert jnp.allclose(out3, reference_forward(x256, params), atol=1e-5, rtol=1e-5)

    # 4) bf16 MXU-operand path (recommended on v5e/v6e/v7x); f32 accumulation.
    out4 = jax.block_until_ready(
        autoencoder_forward(x, params, matmul_dtype=jnp.bfloat16))
    assert out4.shape == (batch, input_dim)
    assert jnp.allclose(out4, ref, atol=2e-2, rtol=2e-2)

    print("KERNEL_OK")
</pallas_src>

<mosaic_0001>
module attributes {stable_mosaic.version = 11 : i64} {
  func.func @autoencoder_kernel(%arg0: i32, %arg1: memref<40x32xf32, #tpu.memory_space<vmem>>, %arg2: memref<32x32xf32, #tpu.memory_space<vmem>>, %arg3: memref<1x32xf32, #tpu.memory_space<vmem>>, %arg4: memref<32x16xf32, #tpu.memory_space<vmem>>, %arg5: memref<1x16xf32, #tpu.memory_space<vmem>>, %arg6: memref<16x32xf32, #tpu.memory_space<vmem>>, %arg7: memref<1x32xf32, #tpu.memory_space<vmem>>, %arg8: memref<32x32xf32, #tpu.memory_space<vmem>>, %arg9: memref<1x32xf32, #tpu.memory_space<vmem>>, %arg10: memref<40x32xf32, #tpu.memory_space<vmem>>) attributes {dimension_semantics = [#tpu.dimension_semantics<parallel>], iteration_bounds = array<i64: 1>, scalar_prefetch = 0 : i64, scratch_operands = 0 : i64, tpu.core_type = #tpu.core_type<tc>, window_params = [{transform_indices = @transform_0, window_bounds = array<i64: 40, 32>}, {pipeline_mode = #tpu.pipeline_mode<synchronous>, transform_indices = @transform_1, window_bounds = array<i64: 32, 32>}, {pipeline_mode = #tpu.pipeline_mode<synchronous>, transform_indices = @transform_2, window_bounds = array<i64: 1, 32>}, {pipeline_mode = #tpu.pipeline_mode<synchronous>, transform_indices = @transform_3, window_bounds = array<i64: 32, 16>}, {pipeline_mode = #tpu.pipeline_mode<synchronous>, transform_indices = @transform_4, window_bounds = array<i64: 1, 16>}, {pipeline_mode = #tpu.pipeline_mode<synchronous>, transform_indices = @transform_5, window_bounds = array<i64: 16, 32>}, {pipeline_mode = #tpu.pipeline_mode<synchronous>, transform_indices = @transform_6, window_bounds = array<i64: 1, 32>}, {pipeline_mode = #tpu.pipeline_mode<synchronous>, transform_indices = @transform_7, window_bounds = array<i64: 32, 32>}, {pipeline_mode = #tpu.pipeline_mode<synchronous>, transform_indices = @transform_8, window_bounds = array<i64: 1, 32>}, {transform_indices = @transform_9, window_bounds = array<i64: 40, 32>}]} {
    %c0 = arith.constant 0 : index
    %c0_0 = arith.constant 0 : index
    %0 = vector.load %arg1[%c0, %c0_0] : memref<40x32xf32, #tpu.memory_space<vmem>>, vector<40x32xf32>
    %c0_1 = arith.constant 0 : index
    %c0_2 = arith.constant 0 : index
    %1 = vector.load %arg2[%c0_1, %c0_2] : memref<32x32xf32, #tpu.memory_space<vmem>>, vector<32x32xf32>
    %cst = arith.constant dense<0.000000e+00> : vector<40x32xf32>
    %2 = tpu.matmul %0, %1, %cst {dimension_numbers = #tpu.dot_dimension_numbers<[1], [0], [0], [1], [0, 0, 1, 1], [], []>} : vector<40x32xf32>, vector<32x32xf32>, vector<40x32xf32> -> vector<40x32xf32>
    %c0_3 = arith.constant 0 : index
    %c0_4 = arith.constant 0 : index
    %3 = vector.load %arg3[%c0_3, %c0_4] : memref<1x32xf32, #tpu.memory_space<vmem>>, vector<1x32xf32>
    %4 = vector.broadcast %3 : vector<1x32xf32> to vector<40x32xf32>
    %5 = arith.addf %2, %4 : vector<40x32xf32>
    %cst_5 = arith.constant 0.000000e+00 : f32
    %6 = vector.broadcast %cst_5 : f32 to vector<40x32xf32>
    %7 = arith.maximumf %5, %6 : vector<40x32xf32>
    %c0_6 = arith.constant 0 : index
    %c0_7 = arith.constant 0 : index
    %8 = vector.load %arg4[%c0_6, %c0_7] : memref<32x16xf32, #tpu.memory_space<vmem>>, vector<32x16xf32>
    %cst_8 = arith.constant dense<0.000000e+00> : vector<40x16xf32>
    %9 = tpu.matmul %7, %8, %cst_8 {dimension_numbers = #tpu.dot_dimension_numbers<[1], [0], [0], [1], [0, 0, 1, 1], [], []>} : vector<40x32xf32>, vector<32x16xf32>, vector<40x16xf32> -> vector<40x16xf32>
    %c0_9 = arith.constant 0 : index
    %c0_10 = arith.constant 0 : index
    %10 = vector.load %arg5[%c0_9, %c0_10] : memref<1x16xf32, #tpu.memory_space<vmem>>, vector<1x16xf32>
    %11 = vector.broadcast %10 : vector<1x16xf32> to vector<40x16xf32>
    %12 = arith.addf %9, %11 : vector<40x16xf32>
    %cst_11 = arith.constant 0.000000e+00 : f32
    %13 = vector.broadcast %cst_11 : f32 to vector<40x16xf32>
    %14 = arith.maximumf %12, %13 : vector<40x16xf32>
    %c0_12 = arith.constant 0 : index
    %c0_13 = arith.constant 0 : index
    %15 = vector.load %arg6[%c0_12, %c0_13] : memref<16x32xf32, #tpu.memory_space<vmem>>, vector<16x32xf32>
    %cst_14 = arith.constant dense<0.000000e+00> : vector<40x32xf32>
    %16 = tpu.matmul %14, %15, %cst_14 {dimension_numbers = #tpu.dot_dimension_numbers<[1], [0], [0], [1], [0, 0, 1, 1], [], []>} : vector<40x16xf32>, vector<16x32xf32>, vector<40x32xf32> -> vector<40x32xf32>
    %c0_15 = arith.constant 0 : index
    %c0_16 = arith.constant 0 : index
    %17 = vector.load %arg7[%c0_15, %c0_16] : memref<1x32xf32, #tpu.memory_space<vmem>>, vector<1x32xf32>
    %18 = vector.broadcast %17 : vector<1x32xf32> to vector<40x32xf32>
    %19 = arith.addf %16, %18 : vector<40x32xf32>
    %cst_17 = arith.constant 0.000000e+00 : f32
    %20 = vector.broadcast %cst_17 : f32 to vector<40x32xf32>
    %21 = arith.maximumf %19, %20 : vector<40x32xf32>
    %c0_18 = arith.constant 0 : index
    %c0_19 = arith.constant 0 : index
    %22 = vector.load %arg8[%c0_18, %c0_19] : memref<32x32xf32, #tpu.memory_space<vmem>>, vector<32x32xf32>
    %cst_20 = arith.constant dense<0.000000e+00> : vector<40x32xf32>
    %23 = tpu.matmul %21, %22, %cst_20 {dimension_numbers = #tpu.dot_dimension_numbers<[1], [0], [0], [1], [0, 0, 1, 1], [], []>} : vector<40x32xf32>, vector<32x32xf32>, vector<40x32xf32> -> vector<40x32xf32>
    %c0_21 = arith.constant 0 : index
    %c0_22 = arith.constant 0 : index
    %24 = vector.load %arg9[%c0_21, %c0_22] : memref<1x32xf32, #tpu.memory_space<vmem>>, vector<1x32xf32>
    %25 = vector.broadcast %24 : vector<1x32xf32> to vector<40x32xf32>
    %26 = arith.addf %23, %25 : vector<40x32xf32>
    %27 = arith.negf %26 : vector<40x32xf32>
    %28 = math.exp %27 : vector<40x32xf32>
    %cst_23 = arith.constant 1.000000e+00 : f32
    %29 = vector.broadcast %cst_23 : f32 to vector<40x32xf32>
    %30 = arith.addf %29, %28 : vector<40x32xf32>
    %31 = arith.divf %29, %30 : vector<40x32xf32>
    %c0_24 = arith.constant 0 : index
    %c0_25 = arith.constant 0 : index
    %32 = vector.load %arg10[%c0_24, %c0_25] : memref<40x32xf32, #tpu.memory_space<vmem>>, vector<40x32xf32>
    tpu.vector_store %arg10[%c0_24, %c0_25], %31 {strides = array<i32>} : memref<40x32xf32, #tpu.memory_space<vmem>>, vector<40x32xf32>,
    return
  }
  func.func @transform_0(%arg0: i32) -> (i32, i32) {
    %c0_i32 = arith.constant 0 : i32
    %c0_i32_0 = arith.constant 0 : i32
    return %arg0, %c0_i32 : i32, i32
  }
  func.func @transform_1(%arg0: i32) -> (i32, i32) {
    %c0_i32 = arith.constant 0 : i32
    %c0_i32_0 = arith.constant 0 : i32
    %c0_i32_1 = arith.constant 0 : i32
    return %c0_i32, %c0_i32_0 : i32, i32
  }
  func.func @transform_2(%arg0: i32) -> (i32, i32) {
    %c0_i32 = arith.constant 0 : i32
    %c0_i32_0 = arith.constant 0 : i32
    %c0_i32_1 = arith.constant 0 : i32
    return %c0_i32, %c0_i32_0 : i32, i32
  }
  func.func @transform_3(%arg0: i32) -> (i32, i32) {
    %c0_i32 = arith.constant 0 : i32
    %c0_i32_0 = arith.constant 0 : i32
    %c0_i32_1 = arith.constant 0 : i32
    return %c0_i32, %c0_i32_0 : i32, i32
  }
  func.func @transform_4(%arg0: i32) -> (i32, i32) {
    %c0_i32 = arith.constant 0 : i32
    %c0_i32_0 = arith.constant 0 : i32
    %c0_i32_1 = arith.constant 0 : i32
    return %c0_i32, %c0_i32_0 : i32, i32
  }
  func.func @transform_5(%arg0: i32) -> (i32, i32) {
    %c0_i32 = arith.constant 0 : i32
    %c0_i32_0 = arith.constant 0 : i32
    %c0_i32_1 = arith.constant 0 : i32
    return %c0_i32, %c0_i32_0 : i32, i32
  }
  func.func @transform_6(%arg0: i32) -> (i32, i32) {
    %c0_i32 = arith.constant 0 : i32
    %c0_i32_0 = arith.constant 0 : i32
    %c0_i32_1 = arith.constant 0 : i32
    return %c0_i32, %c0_i32_0 : i32, i32
  }
  func.func @transform_7(%arg0: i32) -> (i32, i32) {
    %c0_i32 = arith.constant 0 : i32
    %c0_i32_0 = arith.constant 0 : i32
    %c0_i32_1 = arith.constant 0 : i32
    return %c0_i32, %c0_i32_0 : i32, i32
  }
  func.func @transform_8(%arg0: i32) -> (i32, i32) {
    %c0_i32 = arith.constant 0 : i32
    %c0_i32_0 = arith.constant 0 : i32
    %c0_i32_1 = arith.constant 0 : i32
    return %c0_i32, %c0_i32_0 : i32, i32
  }
  func.func @transform_9(%arg0: i32) -> (i32, i32) {
    %c0_i32 = arith.constant 0 : i32
    %c0_i32_0 = arith.constant 0 : i32
    return %arg0, %c0_i32 : i32, i32
  }
}

</mosaic_0001>

<bundles_post_ra>
// kernel: autoencoder_forward.1
= control target key start
LH: loop header
LB: loop body
LE: loop exit
PB: predicated region body
PF: predicated region fallthrough
CT: control target
= control target key end

     0   :  { %v728_v0 = vmov 0.0   ;;  %vm729_vm0 = vmmov 0   ;;  %vm48_vm1 = vcmask 261120   ;;  %vm289_vm2 = vcmask 130048   ;;  %s943_s1 = inlined_call_operand.vmem [shape: f32[32,32], index: 1, kind: input, shape index: {}]   ;;  %s944_s3 = inlined_call_operand.vmem [shape: f32[32,16], index: 3, kind: input, shape index: {}]   ;;  %s945_s0 = inlined_call_operand.vmem [shape: f32[40,32], index: 0, kind: input, shape index: {}]   ;;  %s946_s5 = inlined_call_operand.vmem [shape: f32[16,32], index: 5, kind: input, shape index: {}]   ;;  %s947_s2 = inlined_call_operand.vmem [shape: f32[1,32], index: 2, kind: input, shape index: {}]   ;;  %s948_s7 = inlined_call_operand.vmem [shape: f32[32,32], index: 7, kind: input, shape index: {}]   ;;  %s949_s4 = inlined_call_operand.vmem [shape: f32[1,16], index: 4, kind: input, shape index: {}]   ;;  %s950_s6 = inlined_call_operand.vmem [shape: f32[1,32], index: 6, kind: input, shape index: {}]   ;;  %s951_s8 = inlined_call_operand.vmem [shape: f32[1,32], index: 8, kind: input, shape index: {}]   ;;  %s952_s9 = inlined_call_operand.vmem [shape: f32[40,32], index: 9, kind: output, shape index: {}]  }
   0x1   :  { %618 = vmatprep.subr.mxu0 %v728_v0  ;;  %v40_v1 = vld [vmem:[%s943_s1 + $0x18] sm:$0xff]  ;;  %v39_v2 = vld [vmem:[%s943_s1 + $0x10] sm:$0xff]  ;;  %626 = vmatprep.mubr.msk.f32.mxu0 %vm729_vm0, %v728_v0  ;;  %v38_v3 = vld [vmem:[%s943_s1 + $0x8] sm:$0xff] }
   0x2   :  { %619 = vmatpush3.msra.mxu0 %v40_v1  ;;  %641 = vmatprep.subr.mxu1 %v728_v0  ;;  %v162_v4 = vld [vmem:[%s944_s3 + $0x18] sm:$0xff]  ;;  %v37_v5 = vld [vmem:[%s943_s1] sm:$0xff]  ;;  %v33_v7 = vld [vmem:[%s945_s0 + $0x8] sm:$0xff] }
   0x3   :  { %620 = vmatprep.subr.mxu0 %v728_v0  ;;  %649 = vmatprep.mubr.msk.f32.mxu1 %vm729_vm0, %v728_v0  ;;  %v32_v6 = vld [vmem:[%s945_s0] sm:$0xff]  ;;  %v34_v8 = vld [vmem:[%s945_s0 + $0x10] sm:$0xff]  ;;  %v35_v9 = vld [vmem:[%s945_s0 + $0x18] sm:$0xff] }
   0x4   :  { %621 = vmatpush3.msra.mxu0 %v39_v2  ;;  %642 = vmatpush3.msra.mxu1 %v162_v4  ;;  %v36_v10 = vld [vmem:[%s945_s0 + $0x20] sm:$0xff]  ;;  %v161_v11 = vld [vmem:[%s944_s3 + $0x10] sm:$0xff]  ;;  %v160_v12 = vld [vmem:[%s944_s3 + $0x8] sm:$0xff] }
   0x5   :  { %622 = vmatprep.subr.mxu0 %v728_v0  ;;  %643 = vmatprep.subr.mxu1 %v728_v0  ;;  %v159_v13 = vld [vmem:[%s944_s3] sm:$0xff]  ;;  %v281_v14 = vld [vmem:[%s946_s5 + $0x8] sm:$0xff]  ;;  %v403_v37 = vld [vmem:[%s948_s7 + $0x18] sm:$0xff] }
   0x6   :  { %623 = vmatpush3.msra.mxu0 %v38_v3  ;;  %644 = vmatpush3.msra.mxu1 %v161_v11  ;;  %v280_v15 = vld [vmem:[%s946_s5] sm:$0xff]  ;;  %v402_v38 = vld [vmem:[%s948_s7 + $0x10] sm:$0xff]  ;;  %v401_v39 = vld [vmem:[%s948_s7 + $0x8] sm:$0xff] }
   0x7   :  { %624 = vmatprep.subr.mxu0 %v728_v0  ;;  %645 = vmatprep.subr.mxu1 %v728_v0  ;;  %v555_v16 = vld [vmem:[%s947_s2] ss:$0 sm:$0xff] }
   0x8   :  { %625 = vmatpush3.msra.mxu0 %v37_v5  ;;  %646 = vmatpush3.msra.mxu1 %v160_v12  ;;  %v561_v40 = vld [vmem:[%s949_s4] ss:$0 sm:$0xff] }
   0x9   :  { %627 = vmatmul.mubr.msk.f32.vlgmr.msra.gmra.mxu0 %vm48_vm1, %v32_v6  ;;  %664 = vmatprep.subr.mxu0 %v728_v0  ;;  %v400_v61 = vld [vmem:[%s948_s7] sm:$0xff] }
   0xa   :  { %629 = vmatprep.mubr.msk.f32.mxu0 %vm729_vm0, %v728_v0  ;;  %647 = vmatprep.subr.mxu1 %v728_v0  ;;  %v567_v62 = vld [vmem:[%s950_s6] ss:$0 sm:$0xff] }
   0xb   :  { %648 = vmatpush3.msra.mxu1 %v159_v13  ;;  %665 = vmatpush3.msra.mxu0 %v281_v14 }
   0xc   :  { %683 = vmatprep.subr.mxu1 %v728_v0  ;;  %666 = vmatprep.subr.mxu0 %v728_v0 }
   0xd   :  { %630 = vmatmul.mubr.msk.f32.gmra.mxu0 %vm48_vm1, %v33_v7 }
   0xe   :  { %632 = vmatprep.mubr.msk.f32.mxu0 %vm729_vm0, %v728_v0  ;;  %667 = vmatpush3.msra.mxu0 %v280_v15 }
  0x11   :  { %633 = vmatmul.mubr.msk.f32.gmra.mxu0 %vm48_vm1, %v34_v8 }
  0x12   :  { %635 = vmatprep.mubr.msk.f32.mxu0 %vm729_vm0, %v728_v0 }
  0x15   :  { %636 = vmatmul.mubr.msk.f32.gmra.mxu0 %vm48_vm1, %v35_v9 }
  0x16   :  { %638 = vmatprep.mubr.msk.f32.mxu0 %vm729_vm0, %v728_v0 }
  0x19   :  { %639 = vmatmul.mubr.msk.f32.gmra.mxu0 %vm48_vm1, %v36_v10 }
  0x1a   :  { %668 = vmatprep.mubr.msk.f32.mxu0 %vm729_vm0, %v728_v0 }
  0xc9   :  { %v130_v17 = vpop.f32.mrf.mxu0 }
  0xca   :  { %v131_v18 = vadd.f32 %v555_v16, %v130_v17 }
  0xcb   :  { %v628_v19 = vpop.f32.mrf.mxu0 }
  0xcc   :  { %v154_v20 = vmax.f32 %v131_v18, 0.0 }
  0xcd   :  { %v135_v21 = vpop.f32.mrf.mxu0 }
  0xce   :  { %v136_v22 = vadd.f32 %v555_v16, %v135_v21  ;;  %650 = vmatmul.mubr.msk.f32.vlgmr.msra.gmra.mxu1 %vm48_vm1, %v154_v20  ;;  %v573_v20 = vld [vmem:[%s951_s8] ss:$0 sm:$0xff] }
  0xcf   :  { %v631_v23 = vpop.f32.mrf.mxu0  ;;  %652 = vmatprep.mubr.msk.f32.mxu1 %vm729_vm0, %v728_v0  ;;  %684 = vmatpush3.msra.mxu1 %v403_v37 }
  0xd0   :  { %v155_v24 = vmax.f32 %v136_v22, 0.0  ;;  %685 = vmatprep.subr.mxu1 %v728_v0 }
  0xd1   :  { %v140_v25 = vpop.f32.mrf.mxu0  ;;  %686 = vmatpush3.msra.mxu1 %v402_v38 }
  0xd2   :  { %v141_v26 = vadd.f32 %v555_v16, %v140_v25  ;;  %653 = vmatmul.mubr.msk.f32.gmra.mxu1 %vm48_vm1, %v155_v24  ;;  %687 = vmatprep.subr.mxu1 %v728_v0 }
  0xd3   :  { %v634_v27 = vpop.f32.mrf.mxu0  ;;  %655 = vmatprep.mubr.msk.f32.mxu1 %vm729_vm0, %v728_v0  ;;  %688 = vmatpush3.msra.mxu1 %v401_v39 }
  0xd4   :  { %v156_v28 = vmax.f32 %v141_v26, 0.0  ;;  %689 = vmatprep.subr.mxu1 %v728_v0 }
  0xd5   :  { %v145_v29 = vpop.f32.mrf.mxu0  ;;  %690 = vmatpush3.msra.mxu1 %v400_v61 }
  0xd6   :  { %v146_v30 = vadd.f32 %v555_v16, %v145_v29  ;;  %656 = vmatmul.mubr.msk.f32.gmra.mxu1 %vm48_vm1, %v156_v28 }
  0xd7   :  { %v637_v31 = vpop.f32.mrf.mxu0  ;;  %658 = vmatprep.mubr.msk.f32.mxu1 %vm729_vm0, %v728_v0 }
  0xd8   :  { %v157_v32 = vmax.f32 %v146_v30, 0.0 }
  0xd9   :  { %v150_v33 = vpop.f32.mrf.mxu0 }
  0xda   :  { %v151_v34 = vadd.f32 %v555_v16, %v150_v33  ;;  %659 = vmatmul.mubr.msk.f32.gmra.mxu1 %vm48_vm1, %v157_v32 }
  0xdb   :  { %v640_v35 = vpop.f32.mrf.mxu0  ;;  %661 = vmatprep.mubr.msk.f32.mxu1 %vm729_vm0, %v728_v0 }
  0xdc   :  { %v158_v36 = vmax.f32 %v151_v34, 0.0 }
  0xde   :  { %662 = vmatmul.mubr.msk.f32.gmra.mxu1 %vm48_vm1, %v158_v36 }
  0xdf   :  { %691 = vmatprep.mubr.msk.f32.mxu1 %vm729_vm0, %v728_v0 }
 0x18e   :  { %v251_v41 = vpop.f32.mrf.mxu1 }
 0x18f   :  { %v252_v42 = vadd.f32 %v561_v40, %v251_v41 }
 0x190   :  { %v651_v43 = vpop.f32.mrf.mxu1 }
 0x191   :  { %v275_v44 = vmax.f32 %v252_v42, 0.0 }
 0x192   :  { %v256_v45 = vpop.f32.mrf.mxu1 }
 0x193   :  { %v257_v46 = vadd.f32 %v561_v40, %v256_v45  ;;  %669 = vmatmul.mubr.msk.f32.vlgmr.msra.gmra.mxu0 %vm289_vm2, %v275_v44 }
 0x194   :  { %v654_v47 = vpop.f32.mrf.mxu1  ;;  %671 = vmatprep.mubr.msk.f32.mxu0 %vm729_vm0, %v728_v0 }
 0x195   :  { %v276_v48 = vmax.f32 %v257_v46, 0.0 }
 0x196   :  { %v261_v49 = vpop.f32.mrf.mxu1 }
 0x197   :  { %v262_v50 = vadd.f32 %v561_v40, %v261_v49  ;;  %672 = vmatmul.mubr.msk.f32.gmra.mxu0 %vm289_vm2, %v276_v48 }
 0x198   :  { %v657_v51 = vpop.f32.mrf.mxu1  ;;  %674 = vmatprep.mubr.msk.f32.mxu0 %vm729_vm0, %v728_v0 }
 0x199   :  { %v277_v52 = vmax.f32 %v262_v50, 0.0 }
 0x19a   :  { %v266_v53 = vpop.f32.mrf.mxu1 }
 0x19b   :  { %v267_v54 = vadd.f32 %v561_v40, %v266_v53  ;;  %675 = vmatmul.mubr.msk.f32.gmra.mxu0 %vm289_vm2, %v277_v52 }
 0x19c   :  { %v660_v55 = vpop.f32.mrf.mxu1  ;;  %677 = vmatprep.mubr.msk.f32.mxu0 %vm729_vm0, %v728_v0 }
 0x19d   :  { %v278_v56 = vmax.f32 %v267_v54, 0.0 }
 0x19e   :  { %v271_v57 = vpop.f32.mrf.mxu1 }
 0x19f   :  { %v272_v58 = vadd.f32 %v561_v40, %v271_v57  ;;  %678 = vmatmul.mubr.msk.f32.gmra.mxu0 %vm289_vm2, %v278_v56 }
 0x1a0   :  { %v663_v59 = vpop.f32.mrf.mxu1  ;;  %680 = vmatprep.mubr.msk.f32.mxu0 %vm729_vm0, %v728_v0 }
 0x1a1   :  { %v279_v60 = vmax.f32 %v272_v58, 0.0 }
 0x1a3   :  { %681 = vmatmul.mubr.msk.f32.gmra.mxu0 %vm289_vm2, %v279_v60 }
 0x253   :  { %v371_v63 = vpop.f32.mrf.mxu0 }
 0x254   :  { %v372_v1 = vadd.f32 %v567_v62, %v371_v63 }
 0x255   :  { %v670_v2 = vpop.f32.mrf.mxu0 }
 0x256   :  { %v395_v3 = vmax.f32 %v372_v1, 0.0 }
 0x257   :  { %v376_v4 = vpop.f32.mrf.mxu0 }
 0x258   :  { %v377_v5 = vadd.f32 %v567_v62, %v376_v4  ;;  %692 = vmatmul.mubr.msk.f32.vlgmr.msra.gmra.mxu1 %vm48_vm1, %v395_v3 }
 0x259   :  { %v673_v6 = vpop.f32.mrf.mxu0  ;;  %694 = vmatprep.mubr.msk.f32.mxu1 %vm729_vm0, %v728_v0 }
 0x25a   :  { %v396_v7 = vmax.f32 %v377_v5, 0.0 }
 0x25b   :  { %v381_v8 = vpop.f32.mrf.mxu0 }
 0x25c   :  { %v382_v9 = vadd.f32 %v567_v62, %v381_v8  ;;  %695 = vmatmul.mubr.msk.f32.gmra.mxu1 %vm48_vm1, %v396_v7 }
 0x25d   :  { %v676_v10 = vpop.f32.mrf.mxu0  ;;  %697 = vmatprep.mubr.msk.f32.mxu1 %vm729_vm0, %v728_v0 }
 0x25e   :  { %v397_v11 = vmax.f32 %v382_v9, 0.0 }
 0x25f   :  { %v386_v12 = vpop.f32.mrf.mxu0 }
 0x260   :  { %v387_v13 = vadd.f32 %v567_v62, %v386_v12  ;;  %698 = vmatmul.mubr.msk.f32.gmra.mxu1 %vm48_vm1, %v397_v11 }
 0x261   :  { %v679_v14 = vpop.f32.mrf.mxu0  ;;  %700 = vmatprep.mubr.msk.f32.mxu1 %vm729_vm0, %v728_v0 }
 0x262   :  { %v398_v15 = vmax.f32 %v387_v13, 0.0 }
 0x263   :  { %v391_v16 = vpop.f32.mrf.mxu0 }
 0x264   :  { %v392_v17 = vadd.f32 %v567_v62, %v391_v16  ;;  %701 = vmatmul.mubr.msk.f32.gmra.mxu1 %vm48_vm1, %v398_v15 }
 0x265   :  { %v682_v18 = vpop.f32.mrf.mxu0  ;;  %703 = vmatprep.mubr.msk.f32.mxu1 %vm729_vm0, %v728_v0 }
 0x266   :  { %v399_v19 = vmax.f32 %v392_v17, 0.0 }
 0x268   :  { %704 = vmatmul.mubr.msk.f32.gmra.mxu1 %vm48_vm1, %v399_v19 }
 0x318   :  { %v492_v21 = vpop.f32.mrf.mxu1 }
 0x319   :  { %v493_v22 = vadd.f32 %v573_v20, %v492_v21 }
 0x31a   :  { %v693_v23 = vpop.f32.mrf.mxu1 }
 0x31b   :  { %v579_v24 = vmul.f32 -1.442695, %v493_v22 }
 0x31c   :  { %v497_v25 = vpop.f32.mrf.mxu1 }
 0x31d   :  { %708 = vpow2.f32 %v579_v24  ;;  %v498_v26 = vadd.f32 %v573_v20, %v497_v25 }
 0x31e   :  { %v696_v27 = vpop.f32.mrf.mxu1 }
 0x31f   :  { %v580_v28 = vmul.f32 -1.442695, %v498_v26 }
 0x320   :  { %v502_v29 = vpop.f32.mrf.mxu1 }
 0x321   :  { %710 = vpow2.f32 %v580_v28  ;;  %v503_v30 = vadd.f32 %v573_v20, %v502_v29 }
 0x322   :  { %v699_v0 = vpop.f32.mrf.mxu1 }
 0x323   :  { %v581_v31 = vmul.f32 -1.442695, %v503_v30 }
 0x324   :  { %v507_v32 = vpop.f32.mrf.mxu1 }
 0x325   :  { %712 = vpow2.f32 %v581_v31  ;;  %v508_v33 = vadd.f32 %v573_v20, %v507_v32 }
 0x326   :  { %v702_v34 = vpop.f32.mrf.mxu1 }
 0x327   :  { %v582_v35 = vmul.f32 -1.442695, %v508_v33 }
 0x328   :  { %v512_v36 = vpop.f32.mrf.mxu1 }
 0x329   :  { %714 = vpow2.f32 %v582_v35  ;;  %v513_v37 = vadd.f32 %v573_v20, %v512_v36 }
 0x32a   :  { %v709_v38 = vpop.eup %708  ;;  %v705_v39 = vpop.f32.mrf.mxu1 }
 0x32b   :  { %v531_v40 = vadd.f32 1.0, %v709_v38  ;;  %v583_v41 = vmul.f32 -1.442695, %v513_v37 }
 0x32d   :  { %716 = vrcp.f32 %v531_v40 }
 0x32e   :  { %v711_v42 = vpop.eup %710  ;;  %718 = vpow2.f32 %v583_v41 }
 0x32f   :  { %v532_v43 = vadd.f32 1.0, %v711_v42 }
 0x331   :  { %720 = vrcp.f32 %v532_v43 }
 0x332   :  { %v713_v44 = vpop.eup %712 }
 0x333   :  { %v533_v45 = vadd.f32 1.0, %v713_v44 }
 0x335   :  { %722 = vrcp.f32 %v533_v45 }
 0x336   :  { %v715_v46 = vpop.eup %714 }
 0x337   :  { %v534_v47 = vadd.f32 1.0, %v715_v46 }
 0x339   :  { %724 = vrcp.f32 %v534_v47 }
 0x33a   :  { %v717_v48 = vpop.eup %716 }
 0x33b   :  { %v719_v49 = vpop.eup %718  ;;  %546 = vst.msk [vmem:[%s952_s9] sm:$0xff] %vm48_vm1, %v717_v48 }
 0x33c   :  { %v535_v50 = vadd.f32 1.0, %v719_v49 }
 0x33e   :  { %v721_v51 = vpop.eup %720  ;;  %726 = vrcp.f32 %v535_v50 }
 0x33f   :  { %547 = vst.msk [vmem:[%s952_s9 + $0x8] sm:$0xff] %vm48_vm1, %v721_v51 }
 0x342   :  { %v723_v52 = vpop.eup %722 }
 0x343   :  { %548 = vst.msk [vmem:[%s952_s9 + $0x10] sm:$0xff] %vm48_vm1, %v723_v52 }
 0x346   :  { %v725_v53 = vpop.eup %724 }
 0x347   :  { %549 = vst.msk [vmem:[%s952_s9 + $0x18] sm:$0xff] %vm48_vm1, %v725_v53 }
 0x34b   :  { %v727_v54 = vpop.eup %726 }
 0x34c   :  { %550 = vst.msk [vmem:[%s952_s9 + $0x20] sm:$0xff] %vm48_vm1, %v727_v54 }

</bundles_post_ra>
